<compile_context>
chip_gen: v6e
topology: v6e:2x2x1
jax: 0.10.0
libtpu: 0.0.40
codegen_flags: <defaults>
</compile_context>

<pallas_src>
import functools

import jax
import jax.numpy as jnp
from jax.experimental import pallas as pl
from jax.experimental.pallas import tpu as pltpu

UNK_TOKEN = "<unk>"

_LANE = 128                            # vreg lane width
_FAST_PATH_MAX_VOCAB = 2048            # one-hot MXU fast path cap
_FAST_PATH_MAX_TABLE_BYTES = 4 << 20   # conservative across v5e/v6e/v7x VMEM
_GATHER_ROWS_CAP = 128                 # rows gathered per grid step (DMA path)
_NUM_DMA_SEMS = 8                      # row DMAs share sems round-robin


def _round_up(x, m):
    return ((x + m - 1) // m) * m


def _onehot_matmul_kernel(ids_ref, table_ref, out_ref):
    """Small-vocab fast path: table resident in VMEM, one-hot @ table on MXU."""
    ids = ids_ref[...]                                    # (R, 1) int32
    rows = ids.shape[0]
    vocab = table_ref.shape[0]
    iota = jax.lax.broadcasted_iota(jnp.int32, (rows, vocab), 1)
    onehot = (iota == ids).astype(table_ref.dtype)        # (R, V)
    out_ref[...] = jnp.dot(
        onehot, table_ref[...], preferred_element_type=jnp.float32
    ).astype(out_ref.dtype)


def _dma_gather_kernel(ids_ref, table_hbm, out_ref, sems, *,
                       rows_per_step, num_sems):
    """Large-vocab path: DMA rows straight from HBM into the output block."""
    i = pl.program_id(0)
    copies = []
    # Issue every scalar id read + DMA start before any wait: all row fetches
    # are in flight concurrently and no .wait() breaks SMEM sst->sld
    # forwarding while descriptors are still being issued.
    for r in range(rows_per_step):                        # static unroll
        row_id = ids_ref[i * rows_per_step + r]           # scalar SMEM read
        cp = pltpu.make_async_copy(table_hbm.at[row_id], out_ref.at[r],
                                   sems.at[r % num_sems])
        cp.start()
        copies.append(cp)
    for cp in copies:
        cp.wait()
    # TODO(synk): add a (2, R, D) landing buffer + cross-step prefetch if the
    # per-step exposed HBM latency ever dominates (costs an extra VMEM copy).


def embedding_lookup(indices, table, *, force_gather=False):
    """indices: (S,) int, table: (V, D) -> (S, D) gathered rows."""
    S = int(indices.shape[0])
    V, D = int(table.shape[0]), int(table.shape[1])
    dt = table.dtype
    itemsize = jnp.dtype(dt).itemsize

    # Lane-dense feature dim: pad D to a multiple of 128.  Padded lanes are
    # sliced off at the end.
    d_pad = _round_up(D, _LANE)
    table_p = table if d_pad == D else jnp.pad(table, ((0, 0), (0, d_pad - D)))

    # Clamp ids: an OOB id would otherwise be an unchecked HBM DMA offset.
    ids = jnp.clip(indices.astype(jnp.int32), 0, V - 1)

    # Minimum sublane multiple for the output block given dtype packing
    # (f32 -> 8, bf16 -> 16, int8 -> 32).
    sub = max(8, 32 // itemsize)

    table_bytes = V * d_pad * itemsize
    use_fast = ((not force_gather) and V <= _FAST_PATH_MAX_VOCAB
                and table_bytes <= _FAST_PATH_MAX_TABLE_BYTES)
    # TODO(synk): make the resident-table threshold generation-aware via
    # pltpu.get_tpu_info (v7x: 64 MiB VMEM vs 128 MiB on v5e/v6e).

    rows_cap = 256 if use_fast else _GATHER_ROWS_CAP
    R = min(rows_cap, _round_up(S, sub))
    s_pad = _round_up(S, R)
    if s_pad != S:
        # Tail positions gather row 0 and are sliced off afterwards.
        ids = jnp.concatenate([ids, jnp.zeros((s_pad - S,), jnp.int32)])
    num_tiles = s_pad // R

    if use_fast:
        out = pl.pallas_call(
            _onehot_matmul_kernel,
            out_shape=jax.ShapeDtypeStruct((s_pad, d_pad), dt),
            grid_spec=pltpu.PrefetchScalarGridSpec(
                num_scalar_prefetch=0,
                grid=(num_tiles,),
                in_specs=[
                    pl.BlockSpec((R, 1), lambda i: (i, 0)),        # ids
                    pl.BlockSpec((V, d_pad), lambda i: (0, 0)),    # resident table
                ],
                out_specs=pl.BlockSpec((R, d_pad), lambda i: (i, 0)),
            ),
            compiler_params=pltpu.CompilerParams(
                dimension_semantics=("parallel",)),
        )(ids.reshape(s_pad, 1), table_p)
    else:
        out = pl.pallas_call(
            functools.partial(_dma_gather_kernel, rows_per_step=R,
                              num_sems=_NUM_DMA_SEMS),
            out_shape=jax.ShapeDtypeStruct((s_pad, d_pad), dt),
            grid_spec=pltpu.PrefetchScalarGridSpec(
                num_scalar_prefetch=1,                      # ids -> SMEM
                grid=(num_tiles,),
                in_specs=[pl.BlockSpec(memory_space=pl.ANY)],  # table in HBM
                out_specs=pl.BlockSpec((R, d_pad), lambda i, ids: (i, 0)),
                scratch_shapes=[pltpu.SemaphoreType.DMA((_NUM_DMA_SEMS,))],
            ),
            compiler_params=pltpu.CompilerParams(
                dimension_semantics=("parallel",)),          # seq tiles independent
        )(ids, table_p)

    return out[:S, :D]


class DefaultLexerPallas:
    """JAX/Pallas port of DefaultLexer: simple embedding lookup by word."""

    def __init__(self, word_embedding_size, vocabulary, key):
        vocab = list(vocabulary) + [UNK_TOKEN]               # code_symbols()
        self.itos = vocab
        self.stoi = {word: idx for idx, word in enumerate(vocab)}
        # allocate(): nn.Embedding default init is N(0, 1); deterministic here.
        self.table = jax.random.normal(
            key, (len(self.itos), word_embedding_size), dtype=jnp.float32)

    def forward(self, word_sequence):
        # String -> id mapping is a host-side Python dict lookup (no array
        # equivalent); mirrors the LongTensor construction in PyTorch forward.
        unk = self.stoi[UNK_TOKEN]
        ids = jnp.array([self.stoi.get(w, unk) for w in word_sequence],
                        dtype=jnp.int32)
        return embedding_lookup(ids, self.table)


if __name__ == "__main__":
    key = jax.random.PRNGKey(0)
    k_tab, k_tab2, k_ids2 = jax.random.split(key, 3)

    # --- DefaultLexer demo (small vocab -> VMEM-resident one-hot fast path) --
    vocabulary = ["the", "cat", "sat", "on", "mat", "a", "dog", "ran",
                  "fast", "slow"]                    # 10 words + <unk> = V=11
    word_embedding_size = 32                         # D = 32
    lexer = DefaultLexerPallas(word_embedding_size, vocabulary, k_tab)

    # seq_len = 8, includes two OOV words that map to <unk>
    word_sequence = ["the", "cat", "sat", "on", "zebra", "mat", "quux", "dog"]
    out = jax.block_until_ready(lexer.forward(word_sequence))

    unk = lexer.stoi[UNK_TOKEN]
    ref_ids = jnp.array([lexer.stoi.get(w, unk) for w in word_sequence],
                        dtype=jnp.int32)
    ref = lexer.table[ref_ids]
    assert out.shape == (len(word_sequence), word_embedding_size)
    assert out.dtype == jnp.float32
    assert jnp.allclose(out, ref, atol=1e-5), "fast-path mismatch"

    # --- Large-vocab HBM row-gather path (forced, multi-tile) ---------------
    V2, D2, S2 = 300, 64, 200
    table2 = jax.random.normal(k_tab2, (V2, D2), dtype=jnp.float32)
    ids2 = jax.random.randint(k_ids2, (S2,), 0, V2, dtype=jnp.int32)
    out2 = jax.block_until_ready(
        embedding_lookup(ids2, table2, force_gather=True))
    ref2 = table2[ids2]
    assert out2.shape == (S2, D2)
    assert out2.dtype == jnp.float32
    assert jnp.allclose(out2, ref2, atol=1e-6), "gather-path mismatch"

    print("KERNEL_OK")
</pallas_src>

<mosaic_0001>
module attributes {stable_mosaic.version = 11 : i64} {
  func.func @_onehot_matmul_kernel(%arg0: i32, %arg1: memref<8x1xi32, #tpu.memory_space<vmem>>, %arg2: memref<11x128xf32, #tpu.memory_space<vmem>>, %arg3: memref<8x128xf32, #tpu.memory_space<vmem>>) attributes {dimension_semantics = [#tpu.dimension_semantics<parallel>], iteration_bounds = array<i64: 1>, scalar_prefetch = 0 : i64, scratch_operands = 0 : i64, tpu.core_type = #tpu.core_type<tc>, window_params = [{transform_indices = @transform_0, window_bounds = array<i64: 8, 1>}, {pipeline_mode = #tpu.pipeline_mode<synchronous>, transform_indices = @transform_1, window_bounds = array<i64: 11, 128>}, {transform_indices = @transform_2, window_bounds = array<i64: 8, 128>}]} {
    %c0 = arith.constant 0 : index
    %c0_0 = arith.constant 0 : index
    %0 = vector.load %arg1[%c0, %c0_0] : memref<8x1xi32, #tpu.memory_space<vmem>>, vector<8x1xi32>
    %1 = tpu.iota {dimensions = array<i32: 1>} : vector<8x11xi32>
    %2 = vector.broadcast %0 : vector<8x1xi32> to vector<8x11xi32>
    %3 = arith.cmpi eq, %1, %2 : vector<8x11xi32>
    %4 = arith.extui %3 : vector<8x11xi1> to vector<8x11xi32>
    %5 = arith.sitofp %4 : vector<8x11xi32> to vector<8x11xf32>
    %c0_1 = arith.constant 0 : index
    %c0_2 = arith.constant 0 : index
    %6 = vector.load %arg2[%c0_1, %c0_2] : memref<11x128xf32, #tpu.memory_space<vmem>>, vector<11x128xf32>
    %cst = arith.constant dense<0.000000e+00> : vector<8x128xf32>
    %7 = tpu.matmul %5, %6, %cst {dimension_numbers = #tpu.dot_dimension_numbers<[1], [0], [0], [1], [0, 0, 1, 1], [], []>} : vector<8x11xf32>, vector<11x128xf32>, vector<8x128xf32> -> vector<8x128xf32>
    %c0_3 = arith.constant 0 : index
    %c0_4 = arith.constant 0 : index
    %8 = vector.load %arg3[%c0_3, %c0_4] : memref<8x128xf32, #tpu.memory_space<vmem>>, vector<8x128xf32>
    tpu.vector_store %arg3[%c0_3, %c0_4], %7 {strides = array<i32>} : memref<8x128xf32, #tpu.memory_space<vmem>>, vector<8x128xf32>,
    return
  }
  func.func @transform_0(%arg0: i32) -> (i32, i32) {
    %c0_i32 = arith.constant 0 : i32
    %c0_i32_0 = arith.constant 0 : i32
    return %arg0, %c0_i32 : i32, i32
  }
  func.func @transform_1(%arg0: i32) -> (i32, i32) {
    %c0_i32 = arith.constant 0 : i32
    %c0_i32_0 = arith.constant 0 : i32
    %c0_i32_1 = arith.constant 0 : i32
    return %c0_i32, %c0_i32_0 : i32, i32
  }
  func.func @transform_2(%arg0: i32) -> (i32, i32) {
    %c0_i32 = arith.constant 0 : i32
    %c0_i32_0 = arith.constant 0 : i32
    return %arg0, %c0_i32 : i32, i32
  }
}

</mosaic_0001>

<bundles_post_ra>
// kernel: tpu_custom_call.1
= control target key start
LH: loop header
LB: loop body
LE: loop exit
PB: predicated region body
PF: predicated region fallthrough
CT: control target
= control target key end

     0   :  { %7 = vsyncpa [#allocation3], 0  ;;  %s227_s0 = inlined_call_operand.vmem [shape: s32[8,1], index: 0, kind: input, shape index: {}]   ;;  %s228_s1 = inlined_call_operand.hbm [shape: f32[11,128], index: 1, kind: input, shape index: {}]   ;;  %s229_s2 = inlined_call_operand.hbm [shape: f32[8,128], index: 2, kind: output, shape index: {}]  }
   0x1   :  { %8 = vsyncpa [#allocation4], 0  ;;  %s196_s9 = smov [#allocation2]  }
   0x2   :  { %s16_s10 = sshll.u32 %s196_s9, 4  ;;  %s17_s10 = int_to_ptr.vmem [resolvable:$true] %s16_s10 }
   0x3   :  { %s160_s11 = scalar_lea.vmem %s17_s10, 256  ;;  %p165_p1 = scmp.lt.s32.totalorder %s17_s10, %s17_s10 }
   0x4   :  { %p161_p0 = scmp.ne.s32.totalorder %s17_s10, %s160_s11  ;;  %p166_p2 = scmp.lt.s32.totalorder %s160_s11, %s160_s11 }
   0x6   :  { %p167_p3 = por %p166_p2, %p165_p1 }
   0x8   :  { %p168_p4 = pnand %p167_p3, %p161_p0 }
   0xa   :  { %171 = shalt.err (!%p168_p4)
}
   0xb   :  { %s197_s12 = smov 128   ;;  %s198_s13 = smov 8  }
   0xc   :  { %22 = dma.hbm_to_vmem [thread:$0]  %s228_s1, 256, %s17_s10, [#allocation3], %s197_s12, %s197_s12, %s198_s13  }
   0xd   :  { %192 = dma.done.wait [#allocation3], 256  }
   0xe   :  { %193 = vsyncadd [#allocation3], 4294967040  ;;  %v199_v0 = vmov 0   ;;  %v200_v1 = vmov 0.0   ;;  %vm41_vm0 = vcmask 1042432   ;;  %vm201_vm1 = vmmov 0  }
   0xf   :  { %151 = vset.pattern.permute.xlu0 %v199_v0  ;;  %137 = vmatprep.subr.mxu0 %v200_v1  ;;  %v26_v2 = vld [vmem:[%s227_s0] sm:$0xff]  ;;  %v36_v3 = vld [vmem:[#allocation2 + $0x8] sm:$0x7]  ;;  %v27_v5 = vlaneseq  ;;  %vm37_vm2 = vcmask 89088   ;;  %s202_s1 = smov [#allocation5]  }
  0x10   :  { %141 = vmatprep.mubr.msk.f32.mxu0 %vm201_vm1, %v200_v1  ;;  %v35_v4 = vld [vmem:[#allocation2] sm:$0xff]  ;;  %30 = vperm.xlu0 %151, %v26_v2   ;;  %s122_s18 = sshll.u32 %s202_s1, 4  ;;  %s123_s18 = int_to_ptr.vmem [resolvable:$true] %s122_s18 }
  0x11   :  { %138 = vmatpush3.msk.msra.mxu0 %vm41_vm0, %v36_v3  ;;  %v28_v6 = vand.u32 127, %v27_v5  ;;  %s172_s0 = scalar_lea.vmem %s123_s18, 128  ;;  %p177_p6 = scmp.lt.s32.totalorder %s123_s18, %s123_s18 }
  0x12   :  { %139 = vmatprep.subr.mxu0 %v200_v1  ;;  %p173_p5 = scmp.ne.s32.totalorder %s123_s18, %s172_s0  ;;  %p178_p7 = scmp.lt.s32.totalorder %s172_s0, %s172_s0 }
  0x13   :  { %140 = vmatpush3.msra.mxu0 %v35_v4 }
  0x14   :  { %p179_p8 = por %p178_p7, %p177_p6 }
  0x16   :  { %p180_p9 = pnand %p179_p8, %p173_p5 }
  0x8b   :  { %v31_v7 = vpop.permute.xlu0 %30 }
  0x8c   :  { %vm32_vm3 = vcmp.eq.s32.totalorder %v28_v6, %v31_v7 }
  0x8d   :  { %v131_v8 = vsel %vm32_vm3, 1.0, %v200_v1 }
  0x8e   :  { %142 = vmatmul.mubr.msk.f32.vlgmr.msra.gmra.mxu0 %vm37_vm2, %v131_v8 }
 0x14e   :  { %v111_v9 = vpop.f32.mrf.mxu0 }
 0x14f   :  { %115 = vst [vmem:[#allocation5] sm:$0xff] %v111_v9 }
 0x150   :  { %v143_v10 = vpop.f32.mrf.mxu0 }
 0x151   :  { %183 = shalt.err (!%p180_p9)
}
 0x152   :  { %125 = dma.vmem_to_hbm [thread:$0]  %s123_s18, 128, %s229_s2, [#allocation4]  }
 0x153   :  { %194 = dma.done.wait [#allocation4], 128  }
 0x154   :  { %195 = vsyncadd [#allocation4], 4294967168 }
 0x155   :  { %129 = vsyncpa [#allocation3], 1 }
 0x156   :  { %130 = vsyncpa [#allocation4], 1 }

</bundles_post_ra>
